<compile_context>
chip_gen: v5e
topology: v5e:2x2
jax: 0.10.0
libtpu: 0.0.40
codegen_flags: <defaults>
</compile_context>

<pallas_src>
import math

import jax
import jax.numpy as jnp
from jax.experimental import pallas as pl
from jax.experimental.pallas import tpu as pltpu


_MAX_BATCH_TILE = 1024   # rows per grid step (f32/bf16, H=256 -> ~1-2 MiB live/head)
_MIN_SPLIT_ROWS = 256    # if batch >= this, force >=2 grid steps (v7x: 2 TCs)


def _round_up(x, m):
    return ((x + m - 1) // m) * m


def _make_critic_kernel(num_heads, hidden):
    """Kernel computing `num_heads` fused 3-layer MLP Q heads on one batch tile."""

    def kernel(s_ref, a_ref, w1s_ref, w1a_ref, b1_ref, w2_ref, b2_ref,
               w3_ref, b3_ref, out_ref):
        # MXU operands in bf16; accumulate + elementwise math in f32.
        s = s_ref[...].astype(jnp.bfloat16)            # [TB, Ds]
        a = a_ref[...].astype(jnp.bfloat16)            # [TB, Da]

        # Layer 1, fused across heads (one s-matmul + one a-matmul, N = n*H).
        h1 = jnp.dot(s, w1s_ref[...], preferred_element_type=jnp.float32)
        h1 = h1 + jnp.dot(a, w1a_ref[...], preferred_element_type=jnp.float32)
        h1 = jnp.maximum(h1 + b1_ref[...], 0.0)        # [TB, n*H] f32

        qs = []
        for h in range(num_heads):                     # static unroll (<=2 heads)
            h1_h = h1[:, h * hidden:(h + 1) * hidden].astype(jnp.bfloat16)
            # Layer 2: H x H on the MXU.
            h2 = jnp.dot(h1_h, w2_ref[h], preferred_element_type=jnp.float32)
            h2 = jnp.maximum(h2 + b2_ref[h], 0.0)      # [TB, H] f32
            # Layer 3 (H -> 1): VPU multiply + lane reduction (no N=1 matmul).
            q = jnp.sum(h2 * w3_ref[h], axis=-1, keepdims=True) + b3_ref[h]
            qs.append(q)                               # [TB, 1] f32

        # Single combined store instead of n width-1 masked column writes.
        tb = s_ref.shape[0]
        col = jax.lax.broadcasted_iota(jnp.int32, (tb, num_heads), 1)
        out = jnp.zeros((tb, num_heads), jnp.float32)
        for h, q in enumerate(qs):
            out = jnp.where(col == h, q, out)
        out_ref[...] = out.astype(out_ref.dtype)

    return kernel


def _run_critic_heads(state, action, params, num_heads):
    """Run the fused critic kernel for the first `num_heads` packed heads."""
    state = jnp.asarray(state, jnp.float32)
    action = jnp.asarray(action, jnp.float32)
    batch, ds = state.shape
    da = action.shape[1]
    hidden = params["w2"].shape[-1]
    n = num_heads

    # Packed layer-1 weights are head-major along the last dim, so taking the
    # first n*H columns selects the first n heads.
    w1s = params["w1_s_packed"][:, :n * hidden]   # [Ds, n*H] bf16
    w1a = params["w1_a_packed"][:, :n * hidden]   # [Da, n*H] bf16
    b1 = params["b1_packed"][:, :n * hidden]      # [1,  n*H] f32
    w2 = params["w2"][:n]                         # [n, H, H] bf16
    b2 = params["b2"][:n]                         # [n, 1, H] f32
    w3 = params["w3"][:n]                         # [n, 1, H] f32
    b3 = params["b3"][:n]                         # [n]       f32 (SMEM)

    # Batch tiling: sublane-friendly (multiple of 8); big tiles to amortize the
    # per-step pipeline overhead; >=2 steps when batch is large enough so v7x's
    # second TensorCore gets work.
    batch8 = _round_up(max(batch, 1), 8)
    if batch8 <= _MIN_SPLIT_ROWS:
        tile_b = batch8
    else:
        tile_b = min(_MAX_BATCH_TILE, _round_up(pl.cdiv(batch8, 2), 8))
    batch_pad = _round_up(batch8, tile_b)
    if batch_pad != batch:
        state = jnp.pad(state, ((0, batch_pad - batch), (0, 0)))
        action = jnp.pad(action, ((0, batch_pad - batch), (0, 0)))

    grid = (batch_pad // tile_b,)
    const2 = lambda i: (0, 0)      # resident weights: same block every step
    const3 = lambda i: (0, 0, 0)

    in_specs = [
        pl.BlockSpec((tile_b, ds), lambda i: (i, 0)),        # state tile
        pl.BlockSpec((tile_b, da), lambda i: (i, 0)),        # action tile
        pl.BlockSpec((ds, n * hidden), const2),              # w1_s packed
        pl.BlockSpec((da, n * hidden), const2),              # w1_a packed
        pl.BlockSpec((1, n * hidden), const2),               # b1 packed
        pl.BlockSpec((n, hidden, hidden), const3),           # w2
        pl.BlockSpec((n, 1, hidden), const3),                # b2
        pl.BlockSpec((n, 1, hidden), const3),                # w3 row
        pl.BlockSpec(memory_space=pltpu.MemorySpace.SMEM),   # b3 scalars
    ]
    out_specs = pl.BlockSpec((tile_b, n), lambda i: (i, 0))

    flops = 2 * batch_pad * n * hidden * (ds + da + hidden + 1)
    bytes_accessed = (
        batch_pad * (ds + da) * 4                            # activations in
        + (w1s.size + w1a.size + w2.size) * 2                # bf16 weights
        + (b1.size + b2.size + w3.size + b3.size) * 4        # f32 params
        + batch_pad * n * 4)                                 # output

    out = pl.pallas_call(
        _make_critic_kernel(n, hidden),
        out_shape=jax.ShapeDtypeStruct((batch_pad, n), jnp.float32),
        grid=grid,
        in_specs=in_specs,
        out_specs=out_specs,
        compiler_params=pltpu.CompilerParams(
            dimension_semantics=("parallel",)),
        cost_estimate=pl.CostEstimate(
            flops=flops, transcendentals=0, bytes_accessed=bytes_accessed),
    )(state, action, w1s, w1a, b1, w2, b2, w3, b3)
    return out[:batch]


def _init_linear(key, in_dim, out_dim):
    """torch.nn.Linear default init (U[-1/sqrt(in), 1/sqrt(in)]), weight pre-transposed."""
    kw, kb = jax.random.split(key)
    bound = 1.0 / math.sqrt(in_dim)
    w = jax.random.uniform(kw, (in_dim, out_dim), jnp.float32, -bound, bound)
    b = jax.random.uniform(kb, (out_dim,), jnp.float32, -bound, bound)
    return w, b


def init_critic_params(key, state_dim, action_dim, hidden_dim=256):
    keys = jax.random.split(key, 6)
    in_dim = state_dim + action_dim

    heads = []
    for h in range(2):
        k1, k2, k3 = keys[3 * h:3 * h + 3]
        w1, b1 = _init_linear(k1, in_dim, hidden_dim)
        w2, b2 = _init_linear(k2, hidden_dim, hidden_dim)
        w3, b3 = _init_linear(k3, hidden_dim, 1)
        heads.append(dict(w1=w1, b1=b1, w2=w2, b2=b2, w3=w3, b3=b3))

    # Pack layer-1 weights across heads: columns ordered [head0 | head1] so the
    # kernel can slice h1_all[:, h*H:(h+1)*H] per head.
    w1_stack = jnp.stack([h["w1"] for h in heads], axis=0)            # [2, in, H]
    w1_packed = jnp.transpose(w1_stack, (1, 0, 2)).reshape(in_dim, 2 * hidden_dim)
    b1_packed = jnp.stack([h["b1"] for h in heads], axis=0).reshape(1, 2 * hidden_dim)

    return dict(
        w1_s_packed=w1_packed[:state_dim].astype(jnp.bfloat16),       # [Ds, 2H]
        w1_a_packed=w1_packed[state_dim:].astype(jnp.bfloat16),       # [Da, 2H]
        b1_packed=b1_packed,                                          # [1, 2H] f32
        w2=jnp.stack([h["w2"] for h in heads], 0).astype(jnp.bfloat16),  # [2,H,H]
        b2=jnp.stack([h["b2"][None, :] for h in heads], 0),           # [2,1,H] f32
        w3=jnp.stack([h["w3"].reshape(1, hidden_dim) for h in heads], 0),  # [2,1,H]
        b3=jnp.stack([h["b3"][0] for h in heads], 0),                 # [2] f32
    )


def critic_forward(params, state, action):
    """Equivalent of Critic.forward: returns (q1, q2), each [batch, 1]."""
    if state.ndim == 1:
        state = state[None, :]
    if action.ndim == 1:
        action = action[None, :]
    out = _run_critic_heads(state, action, params, num_heads=2)
    return out[:, 0:1], out[:, 1:2]


def critic_q1_forward(params, state, action):
    """Equivalent of Critic.q1_forward (incl. batch-size reconciliation)."""
    if state.ndim == 1:
        state = state[None, :]
    if action.ndim == 1:
        action = action[None, :]
    if state.shape[0] != action.shape[0]:
        if action.shape[0] == 1:
            action = jnp.broadcast_to(action, (state.shape[0], action.shape[1]))
        elif state.shape[0] == 1:
            state = jnp.broadcast_to(state, (action.shape[0], state.shape[1]))
        else:
            raise ValueError(
                f"Cannot reconcile batch sizes: state={state.shape[0]}, "
                f"action={action.shape[0]}")
    return _run_critic_heads(state, action, params, num_heads=1)


if __name__ == "__main__":
    key = jax.random.PRNGKey(0)
    k_params, k_state, k_action = jax.random.split(key, 3)

    batch = 2
    state_dim = 8
    action_dim = 4
    hidden_dim = 32

    params = init_critic_params(k_params, state_dim, action_dim, hidden_dim)
    state = jax.random.normal(k_state, (batch, state_dim), jnp.float32)
    action = jax.random.normal(k_action, (batch, action_dim), jnp.float32)

    q1, q2 = critic_forward(params, state, action)
    q1 = jax.block_until_ready(q1)
    q2 = jax.block_until_ready(q2)

    # Also exercise q1_forward with a broadcastable action batch of 1.
    q1_only = critic_q1_forward(params, state, action[:1])
    q1_only = jax.block_until_ready(q1_only)

    assert q1.shape == (batch, 1) and q2.shape == (batch, 1)
    assert q1_only.shape == (batch, 1)

    # Cross-check against a plain-JAX f32 reference using the same (bf16-stored)
    # weights.  Tolerance loosened because the kernel feeds bf16 activations to
    # the MXU (f32 accumulation).
    def ref_head(sa, h):
        H = hidden_dim
        w1_s = params["w1_s_packed"][:, h * H:(h + 1) * H].astype(jnp.float32)
        w1_a = params["w1_a_packed"][:, h * H:(h + 1) * H].astype(jnp.float32)
        w1 = jnp.concatenate([w1_s, w1_a], axis=0)
        b1 = params["b1_packed"][:, h * H:(h + 1) * H]
        h1 = jnp.maximum(jnp.dot(sa, w1, preferred_element_type=jnp.float32) + b1, 0.0)
        h2 = jnp.maximum(
            jnp.dot(h1, params["w2"][h].astype(jnp.float32),
                    preferred_element_type=jnp.float32) + params["b2"][h], 0.0)
        return (jnp.sum(h2 * params["w3"][h], axis=-1, keepdims=True)
                + params["b3"][h])

    sa = jnp.concatenate([state, action], axis=1)
    ref_q1 = ref_head(sa, 0)
    ref_q2 = ref_head(sa, 1)
    assert jnp.allclose(q1, ref_q1, atol=3e-2, rtol=3e-2), (q1, ref_q1)
    assert jnp.allclose(q2, ref_q2, atol=3e-2, rtol=3e-2), (q2, ref_q2)

    sa_b = jnp.concatenate(
        [state, jnp.broadcast_to(action[:1], (batch, action_dim))], axis=1)
    ref_q1_only = ref_head(sa_b, 0)
    assert jnp.allclose(q1_only, ref_q1_only, atol=3e-2, rtol=3e-2), (q1_only, ref_q1_only)

    print("KERNEL_OK")
</pallas_src>

<mosaic_0001>
module attributes {stable_mosaic.version = 11 : i64} {
  func.func @kernel(%arg0: i32, %arg1: memref<8x8xf32, #tpu.memory_space<vmem>>, %arg2: memref<8x4xf32, #tpu.memory_space<vmem>>, %arg3: memref<8x64xbf16, #tpu.memory_space<vmem>>, %arg4: memref<4x64xbf16, #tpu.memory_space<vmem>>, %arg5: memref<1x64xf32, #tpu.memory_space<vmem>>, %arg6: memref<2x32x32xbf16, #tpu.memory_space<vmem>>, %arg7: memref<2x1x32xf32, #tpu.memory_space<vmem>>, %arg8: memref<2x1x32xf32, #tpu.memory_space<vmem>>, %arg9: memref<2xf32, #tpu.memory_space<smem>>, %arg10: memref<8x2xf32, #tpu.memory_space<vmem>>) attributes {dimension_semantics = [#tpu.dimension_semantics<parallel>], iteration_bounds = array<i64: 1>, scalar_prefetch = 0 : i64, scratch_operands = 0 : i64, tpu.core_type = #tpu.core_type<tc>, window_params = [{transform_indices = @transform_0, window_bounds = array<i64: 8, 8>}, {transform_indices = @transform_1, window_bounds = array<i64: 8, 4>}, {pipeline_mode = #tpu.pipeline_mode<synchronous>, transform_indices = @transform_2, window_bounds = array<i64: 8, 64>}, {pipeline_mode = #tpu.pipeline_mode<synchronous>, transform_indices = @transform_3, window_bounds = array<i64: 4, 64>}, {pipeline_mode = #tpu.pipeline_mode<synchronous>, transform_indices = @transform_4, window_bounds = array<i64: 1, 64>}, {pipeline_mode = #tpu.pipeline_mode<synchronous>, transform_indices = @transform_5, window_bounds = array<i64: 2, 32, 32>}, {pipeline_mode = #tpu.pipeline_mode<synchronous>, transform_indices = @transform_6, window_bounds = array<i64: 2, 1, 32>}, {pipeline_mode = #tpu.pipeline_mode<synchronous>, transform_indices = @transform_7, window_bounds = array<i64: 2, 1, 32>}, {transform_indices = @transform_8, window_bounds = array<i64: 2>}, {transform_indices = @transform_9, window_bounds = array<i64: 8, 2>}]} {
    %c0 = arith.constant 0 : index
    %c0_0 = arith.constant 0 : index
    %0 = vector.load %arg1[%c0, %c0_0] : memref<8x8xf32, #tpu.memory_space<vmem>>, vector<8x8xf32>
    %1 = arith.truncf %0 : vector<8x8xf32> to vector<8x8xbf16>
    %c0_1 = arith.constant 0 : index
    %c0_2 = arith.constant 0 : index
    %2 = vector.load %arg2[%c0_1, %c0_2] : memref<8x4xf32, #tpu.memory_space<vmem>>, vector<8x4xf32>
    %3 = arith.truncf %2 : vector<8x4xf32> to vector<8x4xbf16>
    %c0_3 = arith.constant 0 : index
    %c0_4 = arith.constant 0 : index
    %4 = vector.load %arg3[%c0_3, %c0_4] : memref<8x64xbf16, #tpu.memory_space<vmem>>, vector<8x64xbf16>
    %cst = arith.constant dense<0.000000e+00> : vector<8x64xf32>
    %5 = tpu.matmul %1, %4, %cst {dimension_numbers = #tpu.dot_dimension_numbers<[1], [0], [0], [1], [0, 0, 1, 1], [], []>} : vector<8x8xbf16>, vector<8x64xbf16>, vector<8x64xf32> -> vector<8x64xf32>
    %c0_5 = arith.constant 0 : index
    %c0_6 = arith.constant 0 : index
    %6 = vector.load %arg4[%c0_5, %c0_6] : memref<4x64xbf16, #tpu.memory_space<vmem>>, vector<4x64xbf16>
    %cst_7 = arith.constant dense<0.000000e+00> : vector<8x64xf32>
    %7 = tpu.matmul %3, %6, %cst_7 {dimension_numbers = #tpu.dot_dimension_numbers<[1], [0], [0], [1], [0, 0, 1, 1], [], []>} : vector<8x4xbf16>, vector<4x64xbf16>, vector<8x64xf32> -> vector<8x64xf32>
    %8 = arith.addf %5, %7 : vector<8x64xf32>
    %c0_8 = arith.constant 0 : index
    %c0_9 = arith.constant 0 : index
    %9 = vector.load %arg5[%c0_8, %c0_9] : memref<1x64xf32, #tpu.memory_space<vmem>>, vector<1x64xf32>
    %10 = vector.broadcast %9 : vector<1x64xf32> to vector<8x64xf32>
    %11 = arith.addf %8, %10 : vector<8x64xf32>
    %cst_10 = arith.constant 0.000000e+00 : f32
    %12 = vector.broadcast %cst_10 : f32 to vector<8x64xf32>
    %13 = arith.maximumf %11, %12 : vector<8x64xf32>
    %14 = vector.extract_strided_slice %13 {offsets = [0, 0], sizes = [8, 32], strides = [1, 1]} : vector<8x64xf32> to vector<8x32xf32>
    %15 = arith.truncf %14 : vector<8x32xf32> to vector<8x32xbf16>
    %c0_11 = arith.constant 0 : index
    %c0_12 = arith.constant 0 : index
    %c0_13 = arith.constant 0 : index
    %16 = vector.load %arg6[%c0_11, %c0_12, %c0_13] : memref<2x32x32xbf16, #tpu.memory_space<vmem>>, vector<1x32x32xbf16>
    %17 = vector.shape_cast %16 : vector<1x32x32xbf16> to vector<32x32xbf16>
    %cst_14 = arith.constant dense<0.000000e+00> : vector<8x32xf32>
    %18 = tpu.matmul %15, %17, %cst_14 {dimension_numbers = #tpu.dot_dimension_numbers<[1], [0], [0], [1], [0, 0, 1, 1], [], []>} : vector<8x32xbf16>, vector<32x32xbf16>, vector<8x32xf32> -> vector<8x32xf32>
    %c0_15 = arith.constant 0 : index
    %c0_16 = arith.constant 0 : index
    %c0_17 = arith.constant 0 : index
    %19 = vector.load %arg7[%c0_15, %c0_16, %c0_17] : memref<2x1x32xf32, #tpu.memory_space<vmem>>, vector<1x1x32xf32>
    %20 = vector.shape_cast %19 : vector<1x1x32xf32> to vector<1x32xf32>
    %21 = vector.broadcast %20 : vector<1x32xf32> to vector<8x32xf32>
    %22 = arith.addf %18, %21 : vector<8x32xf32>
    %cst_18 = arith.constant 0.000000e+00 : f32
    %23 = vector.broadcast %cst_18 : f32 to vector<8x32xf32>
    %24 = arith.maximumf %22, %23 : vector<8x32xf32>
    %c0_19 = arith.constant 0 : index
    %c0_20 = arith.constant 0 : index
    %c0_21 = arith.constant 0 : index
    %25 = vector.load %arg8[%c0_19, %c0_20, %c0_21] : memref<2x1x32xf32, #tpu.memory_space<vmem>>, vector<1x1x32xf32>
    %26 = vector.shape_cast %25 : vector<1x1x32xf32> to vector<1x32xf32>
    %27 = vector.broadcast %26 : vector<1x32xf32> to vector<8x32xf32>
    %28 = arith.mulf %24, %27 : vector<8x32xf32>
    %cst_22 = arith.constant dense<0.000000e+00> : vector<8xf32>
    %29 = vector.multi_reduction <add>, %28, %cst_22 [1] : vector<8x32xf32> to vector<8xf32>
    %30 = vector.shape_cast %29 : vector<8xf32> to vector<8x1xf32>
    %c0_23 = arith.constant 0 : index
    %31 = memref.load %arg9[%c0_23] : memref<2xf32, #tpu.memory_space<smem>>
    %32 = vector.broadcast %31 : f32 to vector<8x1xf32>
    %33 = arith.addf %30, %32 : vector<8x1xf32>
    %34 = vector.extract_strided_slice %13 {offsets = [0, 32], sizes = [8, 32], strides = [1, 1]} : vector<8x64xf32> to vector<8x32xf32>
    %35 = arith.truncf %34 : vector<8x32xf32> to vector<8x32xbf16>
    %c1 = arith.constant 1 : index
    %c0_24 = arith.constant 0 : index
    %c0_25 = arith.constant 0 : index
    %36 = vector.load %arg6[%c1, %c0_24, %c0_25] : memref<2x32x32xbf16, #tpu.memory_space<vmem>>, vector<1x32x32xbf16>
    %37 = vector.shape_cast %36 : vector<1x32x32xbf16> to vector<32x32xbf16>
    %cst_26 = arith.constant dense<0.000000e+00> : vector<8x32xf32>
    %38 = tpu.matmul %35, %37, %cst_26 {dimension_numbers = #tpu.dot_dimension_numbers<[1], [0], [0], [1], [0, 0, 1, 1], [], []>} : vector<8x32xbf16>, vector<32x32xbf16>, vector<8x32xf32> -> vector<8x32xf32>
    %c1_27 = arith.constant 1 : index
    %c0_28 = arith.constant 0 : index
    %c0_29 = arith.constant 0 : index
    %39 = vector.load %arg7[%c1_27, %c0_28, %c0_29] : memref<2x1x32xf32, #tpu.memory_space<vmem>>, vector<1x1x32xf32>
    %40 = vector.shape_cast %39 : vector<1x1x32xf32> to vector<1x32xf32>
    %41 = vector.broadcast %40 : vector<1x32xf32> to vector<8x32xf32>
    %42 = arith.addf %38, %41 : vector<8x32xf32>
    %cst_30 = arith.constant 0.000000e+00 : f32
    %43 = vector.broadcast %cst_30 : f32 to vector<8x32xf32>
    %44 = arith.maximumf %42, %43 : vector<8x32xf32>
    %c1_31 = arith.constant 1 : index
    %c0_32 = arith.constant 0 : index
    %c0_33 = arith.constant 0 : index
    %45 = vector.load %arg8[%c1_31, %c0_32, %c0_33] : memref<2x1x32xf32, #tpu.memory_space<vmem>>, vector<1x1x32xf32>
    %46 = vector.shape_cast %45 : vector<1x1x32xf32> to vector<1x32xf32>
    %47 = vector.broadcast %46 : vector<1x32xf32> to vector<8x32xf32>
    %48 = arith.mulf %44, %47 : vector<8x32xf32>
    %cst_34 = arith.constant dense<0.000000e+00> : vector<8xf32>
    %49 = vector.multi_reduction <add>, %48, %cst_34 [1] : vector<8x32xf32> to vector<8xf32>
    %50 = vector.shape_cast %49 : vector<8xf32> to vector<8x1xf32>
    %c1_35 = arith.constant 1 : index
    %51 = memref.load %arg9[%c1_35] : memref<2xf32, #tpu.memory_space<smem>>
    %52 = vector.broadcast %51 : f32 to vector<8x1xf32>
    %53 = arith.addf %50, %52 : vector<8x1xf32>
    %54 = tpu.iota {dimensions = array<i32: 1>} : vector<8x2xi32>
    %cst_36 = arith.constant 0.000000e+00 : f32
    %55 = vector.broadcast %cst_36 : f32 to vector<8x2xf32>
    %c0_i32 = arith.constant 0 : i32
    %56 = vector.broadcast %c0_i32 : i32 to vector<8x2xi32>
    %57 = arith.cmpi eq, %54, %56 : vector<8x2xi32>
    %58 = vector.shape_cast %33 : vector<8x1xf32> to vector<8x1xf32>
    %59 = vector.broadcast %58 : vector<8x1xf32> to vector<8x2xf32>
    %60 = arith.select %57, %59, %55 : vector<8x2xi1>, vector<8x2xf32>
    %c1_i32 = arith.constant 1 : i32
    %61 = vector.broadcast %c1_i32 : i32 to vector<8x2xi32>
    %62 = arith.cmpi eq, %54, %61 : vector<8x2xi32>
    %63 = vector.shape_cast %53 : vector<8x1xf32> to vector<8x1xf32>
    %64 = vector.broadcast %63 : vector<8x1xf32> to vector<8x2xf32>
    %65 = arith.select %62, %64, %60 : vector<8x2xi1>, vector<8x2xf32>
    %c0_37 = arith.constant 0 : index
    %c0_38 = arith.constant 0 : index
    %66 = vector.load %arg10[%c0_37, %c0_38] : memref<8x2xf32, #tpu.memory_space<vmem>>, vector<8x2xf32>
    tpu.vector_store %arg10[%c0_37, %c0_38], %65 {strides = array<i32>} : memref<8x2xf32, #tpu.memory_space<vmem>>, vector<8x2xf32>,
    return
  }
  func.func @transform_0(%arg0: i32) -> (i32, i32) {
    %c0_i32 = arith.constant 0 : i32
    %c0_i32_0 = arith.constant 0 : i32
    return %arg0, %c0_i32 : i32, i32
  }
  func.func @transform_1(%arg0: i32) -> (i32, i32) {
    %c0_i32 = arith.constant 0 : i32
    %c0_i32_0 = arith.constant 0 : i32
    return %arg0, %c0_i32 : i32, i32
  }
  func.func @transform_2(%arg0: i32) -> (i32, i32) {
    %c0_i32 = arith.constant 0 : i32
    %c0_i32_0 = arith.constant 0 : i32
    %c0_i32_1 = arith.constant 0 : i32
    return %c0_i32, %c0_i32_0 : i32, i32
  }
  func.func @transform_3(%arg0: i32) -> (i32, i32) {
    %c0_i32 = arith.constant 0 : i32
    %c0_i32_0 = arith.constant 0 : i32
    %c0_i32_1 = arith.constant 0 : i32
    return %c0_i32, %c0_i32_0 : i32, i32
  }
  func.func @transform_4(%arg0: i32) -> (i32, i32) {
    %c0_i32 = arith.constant 0 : i32
    %c0_i32_0 = arith.constant 0 : i32
    %c0_i32_1 = arith.constant 0 : i32
    return %c0_i32, %c0_i32_0 : i32, i32
  }
  func.func @transform_5(%arg0: i32) -> (i32, i32, i32) {
    %c0_i32 = arith.constant 0 : i32
    %c0_i32_0 = arith.constant 0 : i32
    %c0_i32_1 = arith.constant 0 : i32
    %c0_i32_2 = arith.constant 0 : i32
    return %c0_i32, %c0_i32_0, %c0_i32_1 : i32, i32, i32
  }
  func.func @transform_6(%arg0: i32) -> (i32, i32, i32) {
    %c0_i32 = arith.constant 0 : i32
    %c0_i32_0 = arith.constant 0 : i32
    %c0_i32_1 = arith.constant 0 : i32
    %c0_i32_2 = arith.constant 0 : i32
    return %c0_i32, %c0_i32_0, %c0_i32_1 : i32, i32, i32
  }
  func.func @transform_7(%arg0: i32) -> (i32, i32, i32) {
    %c0_i32 = arith.constant 0 : i32
    %c0_i32_0 = arith.constant 0 : i32
    %c0_i32_1 = arith.constant 0 : i32
    %c0_i32_2 = arith.constant 0 : i32
    return %c0_i32, %c0_i32_0, %c0_i32_1 : i32, i32, i32
  }
  func.func @transform_8(%arg0: i32) -> i32 {
    %c0_i32 = arith.constant 0 : i32
    %c0_i32_0 = arith.constant 0 : i32
    return %c0_i32 : i32
  }
  func.func @transform_9(%arg0: i32) -> (i32, i32) {
    %c0_i32 = arith.constant 0 : i32
    %c0_i32_0 = arith.constant 0 : i32
    return %arg0, %c0_i32 : i32, i32
  }
}

</mosaic_0001>

<bundles_post_ra>
// kernel: tpu_custom_call.1
= control target key start
LH: loop header
LB: loop body
LE: loop exit
PB: predicated region body
PF: predicated region fallthrough
CT: control target
= control target key end

     0   :  { %14 = vsyncpa [#allocation3], 0  ;;  %s449_s0 = inlined_call_operand.vmem [shape: f32[8,8], index: 0, kind: input, shape index: {}]   ;;  %s450_s1 = inlined_call_operand.vmem [shape: f32[8,4], index: 1, kind: input, shape index: {}]   ;;  %s451_s2 = inlined_call_operand.vmem [shape: bf16[8,64], index: 2, kind: input, shape index: {}]   ;;  %s452_s3 = inlined_call_operand.vmem [shape: bf16[4,64], index: 3, kind: input, shape index: {}]   ;;  %s453_s4 = inlined_call_operand.hbm [shape: f32[1,64], index: 4, kind: input, shape index: {}]   ;;  %s454_s5 = inlined_call_operand.hbm [shape: bf16[2,32,32], index: 5, kind: input, shape index: {}]   ;;  %s455_s6 = inlined_call_operand.vmem [shape: f32[2,1,32], index: 6, kind: input, shape index: {}]   ;;  %s456_s7 = inlined_call_operand.vmem [shape: f32[2,1,32], index: 7, kind: input, shape index: {}]   ;;  %s457_s8 = inlined_call_operand.vmem [shape: f32[2], index: 8, kind: input, shape index: {}]   ;;  %s458_s9 = inlined_call_operand.vmem [shape: f32[8,2], index: 9, kind: output, shape index: {}]  }
   0x1   :  { %15 = vsyncpa [#allocation6], 0  ;;  %s30_s11 = sshll.u32 %s453_s4, 4  ;;  %s31_s11 = int_to_ptr.hbm [resolvable:$true] %s30_s11 }
   0x2   :  { %16 = vsyncpa [#allocation4], 0  ;;  %s353_s12 = smov [#allocation2]   ;;  %s40_s16 = sshll.u32 %s454_s5, 4  ;;  %s41_s16 = int_to_ptr.hbm [resolvable:$true] %s40_s16 }
   0x3   :  { %s32_s13 = sshll.u32 %s353_s12, 4  ;;  %s354_s17 = smov [#allocation5]   ;;  %s33_s13 = int_to_ptr.vmem [resolvable:$true] %s32_s13 }
   0x4   :  { %35 = dma.hbm_to_vmem [thread:$0]  %s31_s11, 16, %s33_s13, [#allocation3]  }
   0x5   :  { %s42_s18 = sshll.u32 %s354_s17, 4  ;;  %s355_s19 = smov 64   ;;  %s43_s18 = int_to_ptr.vmem [resolvable:$true] %s42_s18 }
   0x6   :  { %s356_s20 = smov 4   ;;  %s58_s4 = sshll.u32 %s457_s8, 4  ;;  %s59_s4 = int_to_ptr.vmem [resolvable:$true] %s58_s4 }
   0x7   :  { %48 = dma.hbm_to_vmem [thread:$0]  %s41_s16, 512, %s43_s18, [#allocation6], %s355_s19, %s355_s19, %s356_s20  }
   0x8   :  { %s357_s23 = smov [#allocation7]  }
   0x9   :  { %61 = dma.vmem_to_smem %s59_s4, 16, %s357_s23, [#allocation4]  }
   0xa   :  { %347 = dma.done.wait [#allocation3], 16  }
   0xb   :  { %348 = vsyncadd [#allocation3], 4294967280 }
   0xc   :  { %349 = dma.done.wait [#allocation6], 512  }
   0xd   :  { %350 = vsyncadd [#allocation6], 4294966784 }
   0xe   :  { %351 = dma.done.wait [#allocation4], 16  }
   0xf   :  { %352 = vsyncadd [#allocation4], 4294967280 }
  0x10   :  { %74 = sfence }
  0x11   :  { %v81_v0 = vld [vmem:[%s452_s3] sm:$0x3]  ;;  %vm86_vm0 = vcmask 1041408   ;;  %vm107_vm1 = vcmask 1043456   ;;  %vm82_vm2 = vcmask 31744   ;;  %vm103_vm3 = vcmask 64512  }
  0x12   :  { %v80_v1 = vld [vmem:[%s451_s2] sm:$0xf]  ;;  %v88_v2 = vsel %vm86_vm0, %v81_v0, 0  ;;  %v273_v8 = vld [vmem:[#allocation5 + $0x8] sm:$0xff]  ;;  %v274_v11 = vld [vmem:[#allocation5 + $0x10] sm:$0xff]  ;;  %vm151_vm4 = vcmask 261120   ;;  %v234_v38 = vlaneseq }
  0x13   :  { %v109_v3 = vsel %vm107_vm1, %v80_v1, 0  ;;  %v78_v4 = vld [vmem:[%s450_s1] sm:$0xff]  ;;  %97 = vmatpush.bf16.msra.mxu0 %v88_v2  ;;  %161 = vmatpush.bf16.msra.mxu2 %v273_v8  ;;  %s177_s14 = sld [smem:[#allocation7]]  ;;  %vm240_vm7 = vcmask 15360  }
  0x14   :  { %v76_v5 = vld [vmem:[%s449_s0] sm:$0xff]  ;;  %118 = vmatpush.bf16.msra.mxu1 %v109_v3  ;;  %v79_v6 = vpack.c.bf16 %v78_v4, %v78_v4  ;;  %s358_s0 = smov 96   ;;  %s271_s15 = sld [smem:[#allocation7 + $0x1]]  ;;  %v235_v40 = vand.u32 127, %v234_v38 }
  0x15   :  { %v77_v7 = vpack.c.bf16 %v76_v5, %v76_v5  ;;  %v272_v9 = vld [vmem:[#allocation5] sm:$0xff]  ;;  %v275_v10 = vld [vmem:[#allocation5 + $0x18] sm:$0xff] }
  0x16   :  { %249 = vmatmul.msk.bf16.vlgmr.msra.gmra.mxu0 %vm82_vm2, %v79_v6  ;;  %214 = vmatpush.bf16.msra.mxu3 %v275_v10  ;;  %v282_v12 = vld [vmem:[#allocation2] ss:$0 sm:$0xff]  ;;  %v285_v30 = vld [vmem:[%s455_s6 + $0x1] ss:$0 sm:$0xff]  ;;  %vm236_vm5 = vcmp.eq.s32.totalorder %v235_v40, 0  ;;  %vm238_vm6 = vcmp.eq.s32.totalorder %v235_v40, 1 }
  0x17   :  { %250 = vmatmul.msk.bf16.vlgmr.msra.gmra.mxu1 %vm103_vm3, %v77_v7  ;;  %162 = vmatpush.bf16.msra.mxu2 %v272_v9  ;;  %v283_v22 = vld [vmem:[%s455_s6] ss:$0 sm:$0xff]  ;;  %v286_v33 = vld [vmem:[%s456_s7 + $0x1] ss:$0 sm:$0xff] }
  0x18   :  { %v284_v25 = vld [vmem:[%s456_s7] ss:$0 sm:$0xff] }
  0x19   :  { %v178_v39 = vstv %s177_s14 }
  0x1a   :  { %215 = vmatpush.bf16.msra.mxu3 %v274_v11  ;;  %v232_v43 = vstv %s271_s15 }
  0x93   :  { %v99_v13 = vpop.f32.mrf.mxu0 }
  0x94   :  { %v120_v14 = vpop.f32.mrf.mxu1 }
  0x95   :  { %v121_v15 = vadd.f32 %v120_v14, %v99_v13 }
  0x97   :  { %v128_v16 = vadd.f32 %v282_v12, %v121_v15 }
  0x99   :  { %v129_v17 = vmax.f32 %v128_v16, 0.0 }
  0x9b   :  { %v130_v18 = vpack.c.bf16 %v129_v17, %v129_v17  ;;  %v101_v19 = vpop.f32.mrf.mxu0 }
  0x9c   :  { %v122_v20 = vpop.f32.mrf.mxu1 }
  0x9d   :  { %191 = vrot.lane.b32.xlu0 %v130_v18, %s358_s0  ;;  %259 = vmatmul.msk.bf16.vlgmr.msra.gmra.mxu2 %vm151_vm4, %v130_v18 }
 0x10f   :  { %v192_v21 = vpop.permute.xlu0 %191 }
 0x110   :  { %269 = vmatmul.msk.bf16.vlgmr.msra.gmra.mxu3 %vm151_vm4, %v192_v21 }
 0x120   :  { %v164_v23 = vpop.f32.mrf.mxu2 }
 0x121   :  { %v165_v24 = vadd.f32 %v283_v22, %v164_v23 }
 0x123   :  { %v168_v26 = vmax.f32 %v165_v24, 0.0 }
 0x125   :  { %v173_v27 = vmul.f32 %v284_v25, %v168_v26 }
 0x127   :  { %v174_v28 = vsel %vm151_vm4, %v173_v27, 0.0 }
 0x128   :  { %v166_v29 = vpop.f32.mrf.mxu2  ;;  %175 = vadd.xlane.f32.xlu0 %v174_v28 }
 0x193   :  { %v217_v31 = vpop.f32.mrf.mxu3 }
 0x194   :  { %v218_v32 = vadd.f32 %v285_v30, %v217_v31 }
 0x196   :  { %v221_v34 = vmax.f32 %v218_v32, 0.0 }
 0x198   :  { %v227_v35 = vmul.f32 %v286_v33, %v221_v34 }
 0x19a   :  { %v228_v36 = vsel %vm151_vm4, %v227_v35, 0.0 }
 0x19b   :  { %v219_v37 = vpop.f32.mrf.mxu3  ;;  %229 = vadd.xlane.f32.xlu1 %v228_v36  ;;  %v176_v41 = vpop.xlane.xlu0 %175 }
 0x19c   :  { %v179_v42 = vadd.f32 %v178_v39, %v176_v41 }
 0x19e   :  { %v237_v46 = vsel %vm236_vm5, %v179_v42, 0.0 }
 0x20e   :  { %v230_v44 = vpop.xlane.xlu1 %229 }
 0x20f   :  { %v233_v45 = vadd.f32 %v232_v43, %v230_v44 }
 0x211   :  { %v239_v47 = vsel %vm238_vm6, %v233_v45, %v237_v46 }
 0x212   :  { %241 = vst.msk [vmem:[%s458_s9] sm:$0xff] %vm240_vm7, %v239_v47 }
 0x213   :  { %246 = vsyncpa [#allocation3], 1 }
 0x214   :  { %247 = vsyncpa [#allocation6], 1 }
 0x215   :  { %248 = vsyncpa [#allocation4], 1 }

</bundles_post_ra>
